<compile_context>
chip_gen: v6e
topology: v6e:2x2x1
jax: 0.10.0
libtpu: 0.0.40
codegen_flags: <defaults>
</compile_context>

<pallas_src>
import functools

import jax
import jax.numpy as jnp
from jax.experimental import pallas as pl
from jax.experimental.pallas import tpu as pltpu


# ---------------------------------------------------------------------------
# Fused kernel: conv branches (as shifted matmuls) + ReLU + max-pool + FC
# ---------------------------------------------------------------------------

def _textcnn_kernel(emb_ref, convw_ref, convb_ref, fcw_ref, fcb_ref, out_ref,
                    *, conv_params, max_pad, seq_len):
    # emb_ref  : (bt, Lp, E)          max-padded embeddings (Lp = L + 2*max_pad)
    # convw_ref: (n_convs, max_kh, E, C)  conv weights, zero-padded in kh
    # convb_ref: (n_convs, C)         conv biases (f32)
    # fcw_ref  : (F, O_pad)           FC weight, lane-padded to O_pad (mult. of 128)
    # fcb_ref  : (1, O_pad)           FC bias, lane-padded (f32)
    # out_ref  : (bt, O_pad)          lane-dense FC output (f32)
    emb = emb_ref[...]                                   # (bt, Lp, E)
    bt, _, E = emb.shape
    w_all = convw_ref[...]                               # single tiny VMEM load
    b_all = convb_ref[...]
    C = w_all.shape[-1]

    feats = []
    for i, (kh, pad) in enumerate(conv_params):          # static unroll over branches
        off = max_pad - pad                              # static window offset
        lout = seq_len + 2 * pad - kh + 1
        acc = jnp.zeros((bt * lout, C), jnp.float32)
        for dh in range(kh):                             # static unroll over kernel height
            window = emb[:, off + dh: off + dh + lout, :].reshape(bt * lout, E)
            acc = acc + jnp.dot(window, w_all[i, dh],
                                preferred_element_type=jnp.float32)
        pooled = jnp.max(acc.reshape(bt, lout, C), axis=1)          # (bt, C)
        # bias-add and ReLU are monotone per-channel -> commute with the max.
        feats.append(jnp.maximum(pooled + b_all[i:i + 1, :], 0.0))
    feat = jnp.concatenate(feats, axis=1)                # (bt, n_convs*C)

    out_ref[...] = (jnp.dot(feat.astype(fcw_ref.dtype), fcw_ref[...],
                            preferred_element_type=jnp.float32)
                    + fcb_ref[...])


# ---------------------------------------------------------------------------
# Parameter init (mirrors PyTorch nn.Embedding / nn.Conv2d / nn.Linear)
# ---------------------------------------------------------------------------

def init_params(key, vocab_size, emb_size, padding_idx, output_size,
                out_channels, conv_params):
    keys = jax.random.split(key, 3 + 2 * len(conv_params))
    emb_w = jax.random.normal(keys[0], (vocab_size, emb_size), jnp.float32)
    emb_w = emb_w.at[padding_idx].set(0.0)   # nn.Embedding zeroes the padding_idx row

    conv_w, conv_b = [], []
    for i, (kh, _pad) in enumerate(conv_params):
        fan_in = 1 * kh * emb_size
        bound = 1.0 / (fan_in ** 0.5)
        # PyTorch layout (C, 1, kh, E) -> kernel layout (kh, E, C)
        w = jax.random.uniform(keys[1 + 2 * i], (out_channels, 1, kh, emb_size),
                               jnp.float32, -bound, bound)
        b = jax.random.uniform(keys[2 + 2 * i], (1, out_channels),
                               jnp.float32, -bound, bound)
        conv_w.append(jnp.transpose(w[:, 0], (1, 2, 0)))
        conv_b.append(b)

    feat_dim = len(conv_params) * out_channels
    bound = 1.0 / (feat_dim ** 0.5)
    fc_w = jax.random.uniform(keys[-2], (output_size, feat_dim),
                              jnp.float32, -bound, bound)     # PyTorch (O, F)
    fc_b = jax.random.uniform(keys[-1], (1, output_size),
                              jnp.float32, -bound, bound)
    return dict(emb=emb_w, conv_w=conv_w, conv_b=conv_b,
                fc_w=fc_w.T, fc_b=fc_b)                       # store fc_w as (F, O)


# ---------------------------------------------------------------------------
# Forward (single fused pallas_call)
# ---------------------------------------------------------------------------

def textcnn_forward(params, x, conv_params, *, compute_dtype=jnp.float32):
    # x: (B, L) int32 token ids.  compute_dtype=jnp.bfloat16 is the v6e/v7x MXU path.
    B, L = x.shape
    E = params["emb"].shape[1]
    C = params["conv_w"][0].shape[-1]
    F = params["fc_w"].shape[0]
    O = params["fc_w"].shape[1]
    max_pad = max(p for _, p in conv_params)
    max_kh = max(k for k, _ in conv_params)

    # Embedding gather stays in XLA (don't DMA the whole table into VMEM).
    emb = jnp.take(params["emb"], x, axis=0)                         # (B, L, E)
    # Pad ONCE with max(pad); per-branch windows are static slices in-kernel.
    emb_padded = jnp.pad(emb, ((0, 0), (max_pad, max_pad), (0, 0))).astype(compute_dtype)
    Lp = L + 2 * max_pad

    # Stack per-branch conv weights (zero-pad kh to max_kh) and biases.
    w_stacked = jnp.stack([
        jnp.pad(w, ((0, max_kh - w.shape[0]), (0, 0), (0, 0))).astype(compute_dtype)
        for w in params["conv_w"]])                                  # (n_convs, max_kh, E, C)
    b_stacked = jnp.concatenate(params["conv_b"], axis=0)            # (n_convs, C) f32

    # Lane-dense FC output: pad output dim to a multiple of 128 lanes.
    o_pad = ((O + 127) // 128) * 128
    fc_w = jnp.pad(params["fc_w"], ((0, 0), (0, o_pad - O))).astype(compute_dtype)
    fc_b = jnp.pad(params["fc_b"], ((0, 0), (0, o_pad - O)))         # f32

    # Whole batch per grid step at these sizes; tile + "parallel" shards across
    # TCs (v7x megacore) when B scales.
    bt = B if B <= 128 else 128
    if B % bt:
        bt = B
    nb = pl.cdiv(B, bt)

    kernel = functools.partial(_textcnn_kernel,
                               conv_params=tuple(conv_params),
                               max_pad=max_pad, seq_len=L)
    out = pl.pallas_call(
        kernel,
        out_shape=jax.ShapeDtypeStruct((B, o_pad), jnp.float32),
        grid=(nb,),
        in_specs=[
            pl.BlockSpec((bt, Lp, E), lambda i: (i, 0, 0)),
            pl.BlockSpec(w_stacked.shape, lambda i: (0, 0, 0, 0)),
            pl.BlockSpec(b_stacked.shape, lambda i: (0, 0)),
            pl.BlockSpec(fc_w.shape, lambda i: (0, 0)),
            pl.BlockSpec(fc_b.shape, lambda i: (0, 0)),
        ],
        out_specs=pl.BlockSpec((bt, o_pad), lambda i: (i, 0)),
        compiler_params=pltpu.CompilerParams(dimension_semantics=("parallel",)),
    )(emb_padded, w_stacked, b_stacked, fc_w, fc_b)

    # TODO(synk): dropout is identity at inference (eval mode); training-mode masking omitted.
    return out[:, :O]                                                # (B, output_size)


# ---------------------------------------------------------------------------
# Pure-JAX reference (mirrors the PyTorch forward op-by-op) for validation
# ---------------------------------------------------------------------------

def textcnn_reference(params, x, conv_params):
    emb = params["emb"][x]                                           # (B, L, E)
    pooled = []
    for (kh, pad), w, b in zip(conv_params, params["conv_w"], params["conv_b"]):
        ep = jnp.pad(emb, ((0, 0), (pad, pad), (0, 0)))
        lout = ep.shape[1] - kh + 1
        outs = []
        for l in range(lout):
            s = sum(ep[:, l + dh, :] @ w[dh] for dh in range(kh)) + b
            outs.append(jax.nn.relu(s))                              # ReLU before max (PyTorch order)
        pooled.append(jnp.max(jnp.stack(outs, axis=1), axis=1))      # (B, C)
    feat = jnp.concatenate(pooled, axis=1)
    return feat @ params["fc_w"] + params["fc_b"]


if __name__ == "__main__":
    VOCAB_SIZE, EMB_SIZE, PADDING_IDX = 30, 32, 0
    OUTPUT_SIZE, OUT_CHANNELS = 4, 8
    CONV_PARAMS = ((2, 1), (3, 1), (4, 2))   # (kernel_height, padding)
    B, L = 2, 8

    key = jax.random.PRNGKey(0)
    pkey, xkey = jax.random.split(key)
    params = init_params(pkey, VOCAB_SIZE, EMB_SIZE, PADDING_IDX,
                         OUTPUT_SIZE, OUT_CHANNELS, CONV_PARAMS)
    x = jax.random.randint(xkey, (B, L), 0, VOCAB_SIZE, dtype=jnp.int32)

    out = textcnn_forward(params, x, CONV_PARAMS)
    jax.block_until_ready(out)
    assert out.shape == (B, OUTPUT_SIZE), out.shape

    ref = textcnn_reference(params, x, CONV_PARAMS)
    assert jnp.allclose(out, ref, rtol=1e-4, atol=1e-4), (out, ref)
    print("KERNEL_OK")
</pallas_src>

<mosaic_0001>
module attributes {stable_mosaic.version = 11 : i64} {
  func.func @_textcnn_kernel(%arg0: i32, %arg1: memref<2x12x32xf32, #tpu.memory_space<vmem>>, %arg2: memref<3x4x32x8xf32, #tpu.memory_space<vmem>>, %arg3: memref<3x8xf32, #tpu.memory_space<vmem>>, %arg4: memref<24x128xf32, #tpu.memory_space<vmem>>, %arg5: memref<1x128xf32, #tpu.memory_space<vmem>>, %arg6: memref<2x128xf32, #tpu.memory_space<vmem>>) attributes {dimension_semantics = [#tpu.dimension_semantics<parallel>], iteration_bounds = array<i64: 1>, scalar_prefetch = 0 : i64, scratch_operands = 0 : i64, tpu.core_type = #tpu.core_type<tc>, window_params = [{transform_indices = @transform_0, window_bounds = array<i64: 2, 12, 32>}, {pipeline_mode = #tpu.pipeline_mode<synchronous>, transform_indices = @transform_1, window_bounds = array<i64: 3, 4, 32, 8>}, {pipeline_mode = #tpu.pipeline_mode<synchronous>, transform_indices = @transform_2, window_bounds = array<i64: 3, 8>}, {pipeline_mode = #tpu.pipeline_mode<synchronous>, transform_indices = @transform_3, window_bounds = array<i64: 24, 128>}, {pipeline_mode = #tpu.pipeline_mode<synchronous>, transform_indices = @transform_4, window_bounds = array<i64: 1, 128>}, {transform_indices = @transform_5, window_bounds = array<i64: 2, 128>}]} {
    %c0 = arith.constant 0 : index
    %c0_0 = arith.constant 0 : index
    %c0_1 = arith.constant 0 : index
    %0 = vector.load %arg1[%c0, %c0_0, %c0_1] : memref<2x12x32xf32, #tpu.memory_space<vmem>>, vector<2x12x32xf32>
    %c0_2 = arith.constant 0 : index
    %c0_3 = arith.constant 0 : index
    %c0_4 = arith.constant 0 : index
    %c0_5 = arith.constant 0 : index
    %1 = vector.load %arg2[%c0_2, %c0_3, %c0_4, %c0_5] : memref<3x4x32x8xf32, #tpu.memory_space<vmem>>, vector<3x4x32x8xf32>
    %c0_6 = arith.constant 0 : index
    %c0_7 = arith.constant 0 : index
    %2 = vector.load %arg3[%c0_6, %c0_7] : memref<3x8xf32, #tpu.memory_space<vmem>>, vector<3x8xf32>
    %cst = arith.constant 0.000000e+00 : f32
    %3 = vector.broadcast %cst : f32 to vector<18x8xf32>
    %4 = vector.extract_strided_slice %0 {offsets = [0, 1, 0], sizes = [2, 9, 32], strides = [1, 1, 1]} : vector<2x12x32xf32> to vector<2x9x32xf32>
    %5 = vector.shape_cast %4 : vector<2x9x32xf32> to vector<18x32xf32>
    %6 = vector.extract_strided_slice %1 {offsets = [0, 0, 0, 0], sizes = [1, 1, 32, 8], strides = [1, 1, 1, 1]} : vector<3x4x32x8xf32> to vector<1x1x32x8xf32>
    %7 = vector.shape_cast %6 : vector<1x1x32x8xf32> to vector<32x8xf32>
    %cst_8 = arith.constant dense<0.000000e+00> : vector<18x8xf32>
    %8 = tpu.matmul %5, %7, %cst_8 {dimension_numbers = #tpu.dot_dimension_numbers<[1], [0], [0], [1], [0, 0, 1, 1], [], []>} : vector<18x32xf32>, vector<32x8xf32>, vector<18x8xf32> -> vector<18x8xf32>
    %9 = arith.addf %3, %8 : vector<18x8xf32>
    %10 = vector.extract_strided_slice %0 {offsets = [0, 2, 0], sizes = [2, 9, 32], strides = [1, 1, 1]} : vector<2x12x32xf32> to vector<2x9x32xf32>
    %11 = vector.shape_cast %10 : vector<2x9x32xf32> to vector<18x32xf32>
    %12 = vector.extract_strided_slice %1 {offsets = [0, 1, 0, 0], sizes = [1, 1, 32, 8], strides = [1, 1, 1, 1]} : vector<3x4x32x8xf32> to vector<1x1x32x8xf32>
    %13 = vector.shape_cast %12 : vector<1x1x32x8xf32> to vector<32x8xf32>
    %cst_9 = arith.constant dense<0.000000e+00> : vector<18x8xf32>
    %14 = tpu.matmul %11, %13, %cst_9 {dimension_numbers = #tpu.dot_dimension_numbers<[1], [0], [0], [1], [0, 0, 1, 1], [], []>} : vector<18x32xf32>, vector<32x8xf32>, vector<18x8xf32> -> vector<18x8xf32>
    %15 = arith.addf %9, %14 : vector<18x8xf32>
    %16 = vector.shape_cast %15 : vector<18x8xf32> to vector<2x9x8xf32>
    %cst_10 = arith.constant dense<0xFF800000> : vector<2x8xf32>
    %17 = vector.multi_reduction <maximumf>, %16, %cst_10 [1] : vector<2x9x8xf32> to vector<2x8xf32>
    %18 = vector.extract_strided_slice %2 {offsets = [0, 0], sizes = [1, 8], strides = [1, 1]} : vector<3x8xf32> to vector<1x8xf32>
    %19 = vector.broadcast %18 : vector<1x8xf32> to vector<2x8xf32>
    %20 = arith.addf %17, %19 : vector<2x8xf32>
    %cst_11 = arith.constant 0.000000e+00 : f32
    %21 = vector.broadcast %cst_11 : f32 to vector<2x8xf32>
    %22 = arith.maximumf %20, %21 : vector<2x8xf32>
    %cst_12 = arith.constant 0.000000e+00 : f32
    %23 = vector.broadcast %cst_12 : f32 to vector<16x8xf32>
    %24 = vector.extract_strided_slice %0 {offsets = [0, 1, 0], sizes = [2, 8, 32], strides = [1, 1, 1]} : vector<2x12x32xf32> to vector<2x8x32xf32>
    %25 = vector.shape_cast %24 : vector<2x8x32xf32> to vector<16x32xf32>
    %26 = vector.extract_strided_slice %1 {offsets = [1, 0, 0, 0], sizes = [1, 1, 32, 8], strides = [1, 1, 1, 1]} : vector<3x4x32x8xf32> to vector<1x1x32x8xf32>
    %27 = vector.shape_cast %26 : vector<1x1x32x8xf32> to vector<32x8xf32>
    %cst_13 = arith.constant dense<0.000000e+00> : vector<16x8xf32>
    %28 = tpu.matmul %25, %27, %cst_13 {dimension_numbers = #tpu.dot_dimension_numbers<[1], [0], [0], [1], [0, 0, 1, 1], [], []>} : vector<16x32xf32>, vector<32x8xf32>, vector<16x8xf32> -> vector<16x8xf32>
    %29 = arith.addf %23, %28 : vector<16x8xf32>
    %30 = vector.extract_strided_slice %0 {offsets = [0, 2, 0], sizes = [2, 8, 32], strides = [1, 1, 1]} : vector<2x12x32xf32> to vector<2x8x32xf32>
    %31 = vector.shape_cast %30 : vector<2x8x32xf32> to vector<16x32xf32>
    %32 = vector.extract_strided_slice %1 {offsets = [1, 1, 0, 0], sizes = [1, 1, 32, 8], strides = [1, 1, 1, 1]} : vector<3x4x32x8xf32> to vector<1x1x32x8xf32>
    %33 = vector.shape_cast %32 : vector<1x1x32x8xf32> to vector<32x8xf32>
    %cst_14 = arith.constant dense<0.000000e+00> : vector<16x8xf32>
    %34 = tpu.matmul %31, %33, %cst_14 {dimension_numbers = #tpu.dot_dimension_numbers<[1], [0], [0], [1], [0, 0, 1, 1], [], []>} : vector<16x32xf32>, vector<32x8xf32>, vector<16x8xf32> -> vector<16x8xf32>
    %35 = arith.addf %29, %34 : vector<16x8xf32>
    %36 = vector.extract_strided_slice %0 {offsets = [0, 3, 0], sizes = [2, 8, 32], strides = [1, 1, 1]} : vector<2x12x32xf32> to vector<2x8x32xf32>
    %37 = vector.shape_cast %36 : vector<2x8x32xf32> to vector<16x32xf32>
    %38 = vector.extract_strided_slice %1 {offsets = [1, 2, 0, 0], sizes = [1, 1, 32, 8], strides = [1, 1, 1, 1]} : vector<3x4x32x8xf32> to vector<1x1x32x8xf32>
    %39 = vector.shape_cast %38 : vector<1x1x32x8xf32> to vector<32x8xf32>
    %cst_15 = arith.constant dense<0.000000e+00> : vector<16x8xf32>
    %40 = tpu.matmul %37, %39, %cst_15 {dimension_numbers = #tpu.dot_dimension_numbers<[1], [0], [0], [1], [0, 0, 1, 1], [], []>} : vector<16x32xf32>, vector<32x8xf32>, vector<16x8xf32> -> vector<16x8xf32>
    %41 = arith.addf %35, %40 : vector<16x8xf32>
    %42 = vector.shape_cast %41 : vector<16x8xf32> to vector<2x8x8xf32>
    %cst_16 = arith.constant dense<0xFF800000> : vector<2x8xf32>
    %43 = vector.multi_reduction <maximumf>, %42, %cst_16 [1] : vector<2x8x8xf32> to vector<2x8xf32>
    %44 = vector.extract_strided_slice %2 {offsets = [1, 0], sizes = [1, 8], strides = [1, 1]} : vector<3x8xf32> to vector<1x8xf32>
    %45 = vector.broadcast %44 : vector<1x8xf32> to vector<2x8xf32>
    %46 = arith.addf %43, %45 : vector<2x8xf32>
    %cst_17 = arith.constant 0.000000e+00 : f32
    %47 = vector.broadcast %cst_17 : f32 to vector<2x8xf32>
    %48 = arith.maximumf %46, %47 : vector<2x8xf32>
    %cst_18 = arith.constant 0.000000e+00 : f32
    %49 = vector.broadcast %cst_18 : f32 to vector<18x8xf32>
    %50 = vector.extract_strided_slice %0 {offsets = [0, 0, 0], sizes = [2, 9, 32], strides = [1, 1, 1]} : vector<2x12x32xf32> to vector<2x9x32xf32>
    %51 = vector.shape_cast %50 : vector<2x9x32xf32> to vector<18x32xf32>
    %52 = vector.extract_strided_slice %1 {offsets = [2, 0, 0, 0], sizes = [1, 1, 32, 8], strides = [1, 1, 1, 1]} : vector<3x4x32x8xf32> to vector<1x1x32x8xf32>
    %53 = vector.shape_cast %52 : vector<1x1x32x8xf32> to vector<32x8xf32>
    %cst_19 = arith.constant dense<0.000000e+00> : vector<18x8xf32>
    %54 = tpu.matmul %51, %53, %cst_19 {dimension_numbers = #tpu.dot_dimension_numbers<[1], [0], [0], [1], [0, 0, 1, 1], [], []>} : vector<18x32xf32>, vector<32x8xf32>, vector<18x8xf32> -> vector<18x8xf32>
    %55 = arith.addf %49, %54 : vector<18x8xf32>
    %56 = vector.extract_strided_slice %0 {offsets = [0, 1, 0], sizes = [2, 9, 32], strides = [1, 1, 1]} : vector<2x12x32xf32> to vector<2x9x32xf32>
    %57 = vector.shape_cast %56 : vector<2x9x32xf32> to vector<18x32xf32>
    %58 = vector.extract_strided_slice %1 {offsets = [2, 1, 0, 0], sizes = [1, 1, 32, 8], strides = [1, 1, 1, 1]} : vector<3x4x32x8xf32> to vector<1x1x32x8xf32>
    %59 = vector.shape_cast %58 : vector<1x1x32x8xf32> to vector<32x8xf32>
    %cst_20 = arith.constant dense<0.000000e+00> : vector<18x8xf32>
    %60 = tpu.matmul %57, %59, %cst_20 {dimension_numbers = #tpu.dot_dimension_numbers<[1], [0], [0], [1], [0, 0, 1, 1], [], []>} : vector<18x32xf32>, vector<32x8xf32>, vector<18x8xf32> -> vector<18x8xf32>
    %61 = arith.addf %55, %60 : vector<18x8xf32>
    %62 = vector.extract_strided_slice %0 {offsets = [0, 2, 0], sizes = [2, 9, 32], strides = [1, 1, 1]} : vector<2x12x32xf32> to vector<2x9x32xf32>
    %63 = vector.shape_cast %62 : vector<2x9x32xf32> to vector<18x32xf32>
    %64 = vector.extract_strided_slice %1 {offsets = [2, 2, 0, 0], sizes = [1, 1, 32, 8], strides = [1, 1, 1, 1]} : vector<3x4x32x8xf32> to vector<1x1x32x8xf32>
    %65 = vector.shape_cast %64 : vector<1x1x32x8xf32> to vector<32x8xf32>
    %cst_21 = arith.constant dense<0.000000e+00> : vector<18x8xf32>
    %66 = tpu.matmul %63, %65, %cst_21 {dimension_numbers = #tpu.dot_dimension_numbers<[1], [0], [0], [1], [0, 0, 1, 1], [], []>} : vector<18x32xf32>, vector<32x8xf32>, vector<18x8xf32> -> vector<18x8xf32>
    %67 = arith.addf %61, %66 : vector<18x8xf32>
    %68 = vector.extract_strided_slice %0 {offsets = [0, 3, 0], sizes = [2, 9, 32], strides = [1, 1, 1]} : vector<2x12x32xf32> to vector<2x9x32xf32>
    %69 = vector.shape_cast %68 : vector<2x9x32xf32> to vector<18x32xf32>
    %70 = vector.extract_strided_slice %1 {offsets = [2, 3, 0, 0], sizes = [1, 1, 32, 8], strides = [1, 1, 1, 1]} : vector<3x4x32x8xf32> to vector<1x1x32x8xf32>
    %71 = vector.shape_cast %70 : vector<1x1x32x8xf32> to vector<32x8xf32>
    %cst_22 = arith.constant dense<0.000000e+00> : vector<18x8xf32>
    %72 = tpu.matmul %69, %71, %cst_22 {dimension_numbers = #tpu.dot_dimension_numbers<[1], [0], [0], [1], [0, 0, 1, 1], [], []>} : vector<18x32xf32>, vector<32x8xf32>, vector<18x8xf32> -> vector<18x8xf32>
    %73 = arith.addf %67, %72 : vector<18x8xf32>
    %74 = vector.shape_cast %73 : vector<18x8xf32> to vector<2x9x8xf32>
    %cst_23 = arith.constant dense<0xFF800000> : vector<2x8xf32>
    %75 = vector.multi_reduction <maximumf>, %74, %cst_23 [1] : vector<2x9x8xf32> to vector<2x8xf32>
    %76 = vector.extract_strided_slice %2 {offsets = [2, 0], sizes = [1, 8], strides = [1, 1]} : vector<3x8xf32> to vector<1x8xf32>
    %77 = vector.broadcast %76 : vector<1x8xf32> to vector<2x8xf32>
    %78 = arith.addf %75, %77 : vector<2x8xf32>
    %cst_24 = arith.constant 0.000000e+00 : f32
    %79 = vector.broadcast %cst_24 : f32 to vector<2x8xf32>
    %80 = arith.maximumf %78, %79 : vector<2x8xf32>
    %81 = tpu.concatenate %22, %48, %80 in 1 : vector<2x8xf32>, vector<2x8xf32>, vector<2x8xf32> -> vector<2x24xf32>
    %c0_25 = arith.constant 0 : index
    %c0_26 = arith.constant 0 : index
    %82 = vector.load %arg4[%c0_25, %c0_26] : memref<24x128xf32, #tpu.memory_space<vmem>>, vector<24x128xf32>
    %cst_27 = arith.constant dense<0.000000e+00> : vector<2x128xf32>
    %83 = tpu.matmul %81, %82, %cst_27 {dimension_numbers = #tpu.dot_dimension_numbers<[1], [0], [0], [1], [0, 0, 1, 1], [], []>} : vector<2x24xf32>, vector<24x128xf32>, vector<2x128xf32> -> vector<2x128xf32>
    %c0_28 = arith.constant 0 : index
    %c0_29 = arith.constant 0 : index
    %84 = vector.load %arg5[%c0_28, %c0_29] : memref<1x128xf32, #tpu.memory_space<vmem>>, vector<1x128xf32>
    %85 = vector.broadcast %84 : vector<1x128xf32> to vector<2x128xf32>
    %86 = arith.addf %83, %85 : vector<2x128xf32>
    %c0_30 = arith.constant 0 : index
    %c0_31 = arith.constant 0 : index
    %87 = vector.load %arg6[%c0_30, %c0_31] : memref<2x128xf32, #tpu.memory_space<vmem>>, vector<2x128xf32>
    tpu.vector_store %arg6[%c0_30, %c0_31], %86 {strides = array<i32>} : memref<2x128xf32, #tpu.memory_space<vmem>>, vector<2x128xf32>,
    return
  }
  func.func @transform_0(%arg0: i32) -> (i32, i32, i32) {
    %c0_i32 = arith.constant 0 : i32
    %c0_i32_0 = arith.constant 0 : i32
    %c0_i32_1 = arith.constant 0 : i32
    return %arg0, %c0_i32, %c0_i32_0 : i32, i32, i32
  }
  func.func @transform_1(%arg0: i32) -> (i32, i32, i32, i32) {
    %c0_i32 = arith.constant 0 : i32
    %c0_i32_0 = arith.constant 0 : i32
    %c0_i32_1 = arith.constant 0 : i32
    %c0_i32_2 = arith.constant 0 : i32
    %c0_i32_3 = arith.constant 0 : i32
    return %c0_i32, %c0_i32_0, %c0_i32_1, %c0_i32_2 : i32, i32, i32, i32
  }
  func.func @transform_2(%arg0: i32) -> (i32, i32) {
    %c0_i32 = arith.constant 0 : i32
    %c0_i32_0 = arith.constant 0 : i32
    %c0_i32_1 = arith.constant 0 : i32
    return %c0_i32, %c0_i32_0 : i32, i32
  }
  func.func @transform_3(%arg0: i32) -> (i32, i32) {
    %c0_i32 = arith.constant 0 : i32
    %c0_i32_0 = arith.constant 0 : i32
    %c0_i32_1 = arith.constant 0 : i32
    return %c0_i32, %c0_i32_0 : i32, i32
  }
  func.func @transform_4(%arg0: i32) -> (i32, i32) {
    %c0_i32 = arith.constant 0 : i32
    %c0_i32_0 = arith.constant 0 : i32
    %c0_i32_1 = arith.constant 0 : i32
    return %c0_i32, %c0_i32_0 : i32, i32
  }
  func.func @transform_5(%arg0: i32) -> (i32, i32) {
    %c0_i32 = arith.constant 0 : i32
    %c0_i32_0 = arith.constant 0 : i32
    return %arg0, %c0_i32 : i32, i32
  }
}

</mosaic_0001>

<bundles_post_ra>
// kernel: tpu_custom_call.1
= control target key start
LH: loop header
LB: loop body
LE: loop exit
PB: predicated region body
PF: predicated region fallthrough
CT: control target
= control target key end

     0   :  { %v70_v2 = vlaneseq  ;;  %v2318_v3 = vmov 0.0   ;;  %v2319_v7 = vmov 1966171168   ;;  %vm2320_vm0 = vmmov 0   ;;  %s2911_s0 = inlined_call_operand.vmem [shape: f32[2,12,32], index: 0, kind: input, shape index: {}]   ;;  %s2912_s1 = inlined_call_operand.vmem [shape: f32[3,4,32,8], index: 1, kind: input, shape index: {}]   ;;  %s2913_s2 = inlined_call_operand.vmem [shape: f32[3,8], index: 2, kind: input, shape index: {}]   ;;  %s2914_s3 = inlined_call_operand.vmem [shape: f32[24,128], index: 3, kind: input, shape index: {}]   ;;  %s2915_s4 = inlined_call_operand.vmem [shape: f32[1,128], index: 4, kind: input, shape index: {}]   ;;  %s2916_s5 = inlined_call_operand.hbm [shape: f32[2,128], index: 5, kind: output, shape index: {}]  }
   0x1   :  { %v32_v0 = vld [vmem:[%s2912_s1 + $0x38] sm:$0xff]  ;;  %2144 = vmatprep.subr.mxu0 %v2318_v3  ;;  %2161 = vmatprep.subr.mxu1 %v2318_v3  ;;  %v31_v4 = vld [vmem:[%s2912_s1 + $0x30] sm:$0xff]  ;;  %v2371_v6 = vld [vmem:[%s2911_s0] sm:$0xff]  ;;  %v68_v8 = vunpack.c.l.s4 %v2319_v7 }
   0x2   :  { %v28_v1 = vld [vmem:[%s2912_s1 + $0x18] sm:$0xff]  ;;  %v27_v5 = vld [vmem:[%s2912_s1 + $0x10] sm:$0xff]  ;;  %2145 = vmatpush3.msra.mxu0 %v32_v0  ;;  %v2373_v9 = vshrl.u32 %v70_v2, 7  ;;  %v30_v10 = vld [vmem:[%s2912_s1 + $0x28] sm:$0xff]  ;;  %v66_v12 = vcombine.high %v2371_v6, %v2371_v6  ;;  %2152 = vmatprep.mubr.msk.f32.mxu0 %vm2320_vm0, %v2318_v3 }
   0x3   :  { %2162 = vmatpush3.msra.mxu1 %v28_v1  ;;  %2146 = vmatprep.subr.mxu0 %v2318_v3  ;;  %v26_v11 = vld [vmem:[%s2912_s1 + $0x8] sm:$0xff]  ;;  %v69_v13 = vunpack.c.0.s8 %v68_v8  ;;  %v2388_v14 = vld [vmem:[%s2911_s0 + $0x10] sm:$0xff]  ;;  %v29_v15 = vld [vmem:[%s2912_s1 + $0x20] sm:$0xff] }
   0x4   :  { %2163 = vmatprep.subr.mxu1 %v2318_v3  ;;  %2147 = vmatpush3.msra.mxu0 %v31_v4  ;;  %v2398_v16 = vld [vmem:[%s2911_s0 + $0x8] sm:$0xf]  ;;  %v2408_v18 = vld [vmem:[%s2912_s1 + $0xb8] sm:$0xff]  ;;  %v25_v19 = vld [vmem:[%s2912_s1] sm:$0xff]  ;;  %v137_v20 = vcombine.high %v2388_v14, %v2388_v14 }
   0x5   :  { %2164 = vmatpush3.msra.mxu1 %v27_v5  ;;  %2148 = vmatprep.subr.mxu0 %v2318_v3  ;;  %v2403_v17 = vsub.s32 %v69_v13, %v2373_v9  ;;  %v2425_v24 = vld [vmem:[%s2912_s1 + $0x98] sm:$0xff] }
   0x6   :  { %2165 = vmatprep.subr.mxu1 %v2318_v3  ;;  %2149 = vmatpush3.msra.mxu0 %v30_v10 }
   0x7   :  { %2150 = vmatprep.subr.mxu0 %v2318_v3  ;;  %2166 = vmatpush3.msra.mxu1 %v26_v11  ;;  %v73_v21 = vrot.slane %v2371_v6, %v2403_v17  ;;  %v80_v22 = vrot.slane %v66_v12, %v2403_v17  ;;  %v121_v23 = vrot.slane %v2398_v16, %v2403_v17 }
   0x8   :  { %2151 = vmatpush3.msra.mxu0 %v29_v15  ;;  %2167 = vmatprep.subr.mxu1 %v2318_v3  ;;  %v144_v25 = vrot.slane %v2388_v14, %v2403_v17  ;;  %v151_v35 = vrot.slane %v137_v20, %v2403_v17 }
   0x9   :  { %2178 = vmatprep.subr.mxu0 %v2408_v18  ;;  %2168 = vmatpush3.msra.mxu1 %v25_v19  ;;  %v81_v26 = vcombine.high %v73_v21, %v73_v21  ;;  %v82_v27 = vcombine.high %v80_v22, %v80_v22  ;;  %v2431_v28 = vrot.slane %v73_v21, %v2403_v17 }
   0xa   :  { %v96_v29 = vrot.slane %v80_v22, %v2403_v17  ;;  %2169 = vmatprep.mubr.msk.f32.mxu1 %vm2320_vm0, %v2318_v3  ;;  %v122_v30 = vcombine.high %v121_v23, %v121_v23  ;;  %v2437_v31 = vrot.slane %v121_v23, %v2403_v17  ;;  %2189 = vmatprep.subr.mxu1 %v2425_v24 }
   0xb   :  { %v2441_v32 = vrot.slane %v81_v26, %v2403_v17  ;;  %v110_v33 = vrot.slane %v82_v27, %v2403_v17  ;;  %v111_v34 = vcombine.high %v2431_v28, %v2431_v28 }
   0xc   :  { %v2448_v36 = vrot.slane %v122_v30, %v2403_v17  ;;  %v112_v37 = vcombine.high %v96_v29, %v96_v29 }
   0xd   :  { %10 = vsyncpa [#allocation3], 0  ;;  %v2043_v38 = vcombine.high %v2431_v28, %v2441_v32  ;;  %v211_v39 = vcombine.low %v96_v29, %v110_v33  ;;  %v2044_v40 = vcombine.high %v96_v29, %v110_v33  ;;  %v152_v41 = vcombine.high %v144_v25, %v144_v25  ;;  %v2460_v46 = vld [vmem:[%s2911_s0 + $0x18] sm:$0xf]  ;;  %v39_v19 = vld [vmem:[%s2912_s1 + $0xb0] sm:$0xff]  ;;  %s2322_s26 = smov 16  }
   0xe   :  { %v213_v42 = vcombine.low %v2437_v31, %v2448_v36  ;;  %v113_v43 = vcombine.high %v2441_v32, %v2441_v32  ;;  %v114_v44 = vcombine.high %v110_v33, %v110_v33  ;;  %v410_v45 = vcombine.low %v2441_v32, %v111_v34  ;;  %s2323_s29 = smov [#allocation2]  }
   0xf   :  { %v2463_v47 = vrot.slane %v2043_v38, %v2403_v17  ;;  %v2466_v48 = vrot.slane %v211_v39, %v2403_v17  ;;  %v2469_v49 = vrot.slane %v2044_v40, %v2403_v17  ;;  %v153_v50 = vcombine.high %v151_v35, %v151_v35  ;;  %s2035_s30 = sshll.u32 %s2323_s29, 4  ;;  %s2036_s30 = int_to_ptr.vmem [resolvable:$true] %s2035_s30 }
  0x10   :  { %v241_v51 = vrot.slane %v213_v42, %v2403_v17  ;;  %v411_v52 = vcombine.low %v113_v43, %v96_v29  ;;  %v412_v53 = vcombine.low %v110_v33, %v112_v37  ;;  %v413_v54 = vcombine.low %v114_v44, %v2437_v31  ;;  %v38_v33 = vld [vmem:[%s2912_s1 + $0xa8] sm:$0xff]  ;;  %v35_v37 = vld [vmem:[%s2912_s1 + $0x90] sm:$0xff]  ;;  %s2296_s6 = scalar_lea.vmem %s2036_s30, 32  ;;  %p2301_p1 = scmp.lt.s32.totalorder %s2036_s30, %s2036_s30 }
  0x11   :  { %v242_v55 = vcombine.low %v2463_v47, %v2466_v48  ;;  %v420_v56 = vrot.slane %v410_v45, %v2403_v17  ;;  %v167_v57 = vrot.slane %v151_v35, %v2403_v17  ;;  %v2479_v58 = vrot.slane %v2460_v46, %v2403_v17  ;;  %v34_v45 = vld [vmem:[%s2912_s1 + $0x88] sm:$0xff]  ;;  %p2297_p0 = scmp.ne.s32.totalorder %s2036_s30, %s2296_s6  ;;  %p2302_p2 = scmp.lt.s32.totalorder %s2296_s6, %s2296_s6 }
  0x12   :  { %v243_v59 = vcombine.low %v2469_v49, %v241_v51  ;;  %v2483_v60 = vrot.slane %v411_v52, %v2403_v17  ;;  %v2486_v61 = vrot.slane %v412_v53, %v2403_v17  ;;  %v2489_v62 = vrot.slane %v413_v54, %v2403_v17  ;;  %v44_v53 = vld [vmem:[%s2912_s1 + $0xd8] sm:$0xff] }
  0x13   :  { %v250_v63 = vrot.slane %v242_v55, %v2403_v17  ;;  %v2493_v0 = vrot.slane %v144_v25, %v2403_v17  ;;  %v2496_v1 = vrot.slane %v152_v41, %v2403_v17  ;;  %v181_v2 = vrot.slane %v153_v50, %v2403_v17  ;;  %v37_v41 = vld [vmem:[%s2912_s1 + $0xa0] sm:$0xff]  ;;  %p2303_p3 = por %p2302_p2, %p2301_p1 }
  0x14   :  { %v257_v4 = vrot.slane %v243_v59, %v2403_v17  ;;  %v442_v5 = vcombine.low %v420_v56, %v2483_v60  ;;  %v443_v7 = vcombine.low %v2486_v61, %v2489_v62  ;;  %vm323_vm1 = vcmask 261120   ;;  %v33_v56 = vld [vmem:[%s2912_s1 + $0x80] sm:$0xff] }
  0x15   :  { %v183_v8 = vcombine.high %v167_v57, %v167_v57  ;;  %v184_v10 = vcombine.high %v2496_v1, %v2496_v1  ;;  %v185_v11 = vcombine.high %v181_v2, %v181_v2  ;;  %v2514_v20 = vrot.slane %v2479_v58, %v2403_v17  ;;  %p2304_p4 = pnand %p2303_p3, %p2297_p0 }
  0x16   :  { %v2505_v12 = vcombine.low %v250_v63, %v257_v4  ;;  %v450_v13 = vrot.slane %v442_v5, %v2403_v17  ;;  %v457_v15 = vrot.slane %v443_v7, %v2403_v17  ;;  %v2045_v21 = vcombine.high %v2437_v31, %v2493_v0 }
  0x17   :  { %v260_v22 = vcombine.low %v184_v10, %v167_v57  ;;  %v261_v25 = vcombine.low %v181_v2, %v183_v8  ;;  %v459_v26 = vcombine.low %v2448_v36, %v2496_v1  ;;  %v2049_v27 = vcombine.high %v2493_v0, %v2496_v1 }
  0x18   :  { %2153 = vmatmul.mubr.msk.f32.vlgmr.msra.gmra.mxu0 %vm323_vm1, %v2505_v12  ;;  %v2520_v23 = vcombine.low %v450_v13, %v457_v15  ;;  %v262_v29 = vcombine.low %v185_v11, %v2514_v20  ;;  %v269_v30 = vrot.slane %v2045_v21, %v2403_v17  ;;  %v461_v35 = vcombine.low %v167_v57, %v181_v2 }
  0x19   :  { %2179 = vmatpush3.msra.mxu0 %v2408_v18  ;;  %2155 = vmatprep.mubr.msk.f32.mxu0 %vm2320_vm0, %v2318_v3  ;;  %v2537_v34 = vrot.slane %v260_v22, %v2403_v17  ;;  %v2540_v18 = vrot.slane %v261_v25, %v2403_v17  ;;  %v2050_v39 = vcombine.high %v167_v57, %v181_v2  ;;  %vm897_vm2 = vcmask 1045504  }
  0x1a   :  { %2170 = vmatmul.mubr.msk.f32.vlgmr.msra.gmra.mxu1 %vm323_vm1, %v2520_v23  ;;  %2180 = vmatprep.subr.mxu0 %v39_v19  ;;  %v2546_v38 = vrot.slane %v262_v29, %v2403_v17  ;;  %v469_v40 = vrot.slane %v459_v26, %v2403_v17  ;;  %v476_v43 = vrot.slane %v2049_v27, %v2403_v17  ;;  %v898_v2 = vrot.slane %v2371_v6, 2 }
  0x1b   :  { %2181 = vmatpush3.msra.mxu0 %v39_v19  ;;  %2172 = vmatprep.mubr.msk.f32.mxu1 %vm2320_vm0, %v2318_v3  ;;  %v291_v42 = vcombine.low %v269_v30, %v2537_v34  ;;  %v2557_v44 = vrot.slane %v461_v35, %v2403_v17  ;;  %v2566_v51 = vrot.slane %v2050_v39, %v2403_v17  ;;  %v899_v4 = vrot.slane %v2398_v16, 2 }
  0x1c   :  { %2182 = vmatprep.subr.mxu0 %v38_v33  ;;  %2190 = vmatpush3.msra.mxu1 %v2425_v24  ;;  %v292_v50 = vcombine.low %v2540_v18, %v2546_v38  ;;  %v193_v52 = vcombine.high %v2479_v58, %v2479_v58  ;;  %v491_v54 = vcombine.low %v469_v40, %v476_v43  ;;  %v891_v11 = vrot.slane %v2371_v6, 1 }
  0x1d   :  { %2183 = vmatpush3.msra.mxu0 %v38_v33  ;;  %2191 = vmatprep.subr.mxu1 %v35_v37  ;;  %v299_v24 = vrot.slane %v291_v42, %v2403_v17  ;;  %v209_v55 = vcombine.high %v2514_v20, %v2514_v20  ;;  %v492_v58 = vcombine.low %v2557_v44, %v2566_v51  ;;  %v892_v21 = vrot.slane %v2398_v16, 1 }
  0x1e   :  { %2192 = vmatpush3.msra.mxu1 %v35_v37  ;;  %2184 = vmatprep.subr.mxu0 %v37_v41  ;;  %v306_v57 = vrot.slane %v292_v50, %v2403_v17  ;;  %v2583_v59 = vrot.slane %v193_v52, %v2403_v17  ;;  %v499_v63 = vrot.slane %v491_v54, %v2403_v17  ;;  %v901_v25 = vrot.slane %v2388_v14, 2 }
  0x1f   :  { %2193 = vmatprep.subr.mxu1 %v34_v45  ;;  %2185 = vmatpush3.msra.mxu0 %v37_v41  ;;  %v506_v7 = vrot.slane %v492_v58, %v2403_v17  ;;  %v900_v22 = vsel %vm897_vm2, %v898_v2, %v899_v4  ;;  %v902_v26 = vrot.slane %v2460_v46, 2  ;;  %vm890_vm3 = vcmask 1046528   ;;  %v49_v58 = vld [vmem:[%s2912_s1 + $0x120] sm:$0xff] }
  0x20   :  { %2194 = vmatpush3.msra.mxu1 %v34_v45  ;;  %2200 = vmatprep.subr.mxu0 %v44_v53  ;;  %v2588_v5 = vcombine.low %v299_v24, %v306_v57  ;;  %v308_v8 = vcombine.low %v2583_v59, %v209_v55  ;;  %v508_v10 = vcombine.low %v2514_v20, %v2583_v59  ;;  %v1063_v30 = vrot.slane %v2371_v6, 3  ;;  %v42_v45 = vld [vmem:[%s2912_s1 + $0xc8] sm:$0xff]  ;;  %v51_v24 = vld [vmem:[%s2912_s1 + $0x130] sm:$0xff] }
  0x21   :  { %2195 = vmatprep.subr.mxu1 %v33_v56  ;;  %v2597_v13 = vcombine.low %v499_v63, %v506_v7  ;;  %v1064_v33 = vrot.slane %v2398_v16, 3  ;;  %v894_v35 = vrot.slane %v2388_v14, 1  ;;  %v895_v37 = vrot.slane %v2460_v46, 1 }
  0x22   :  { %2196 = vmatpush3.msra.mxu1 %v33_v56  ;;  %2156 = vmatmul.mubr.msk.f32.gmra.mxu0 %vm323_vm1, %v2588_v5  ;;  %v315_v15 = vrot.slane %v308_v8, %v2403_v17  ;;  %v2601_v19 = vrot.slane %v508_v10, %v2403_v17  ;;  %vm1062_vm4 = vcmask 1044480   ;;  %v893_v39 = vsel %vm890_vm3, %v891_v11, %v892_v21  ;;  %v46_v10 = vld [vmem:[%s2912_s1 + $0x108] sm:$0xff] }
  0x23   :  { %2211 = vmatprep.subr.mxu1 %v2318_v3  ;;  %2158 = vmatprep.mubr.msk.f32.mxu0 %vm2320_vm0, %v2318_v3  ;;  %v1252_v40 = vcombine.low %v2431_v28, %v2441_v32  ;;  %v903_v6 = vsel %vm897_vm2, %v901_v25, %v902_v26  ;;  %v1065_v16 = vsel %vm1062_vm4, %v1063_v30, %v1064_v33  ;;  %v43_v28 = vld [vmem:[%s2912_s1 + $0xd0] sm:$0xff]  ;;  %v52_v32 = vld [vmem:[%s2912_s1 + $0x138] sm:$0xff]  ;;  %v1066_v50 = vrot.slane %v2388_v14, 3  ;;  %v41_v14 = vld [vmem:[%s2912_s1 + $0xc0] sm:$0xff] }
  0x24   :  { %2173 = vmatmul.mubr.msk.f32.gmra.mxu1 %vm323_vm1, %v2597_v13  ;;  %v2613_v27 = vrot.slane %v315_v15, %v2403_v17  ;;  %v2617_v29 = vrot.slane %v2601_v19, %v2403_v17  ;;  %v182_v41 = vcombine.high %v2493_v0, %v2493_v0  ;;  %v896_v42 = vsel %vm890_vm3, %v894_v35, %v895_v37  ;;  %v55_v25 = vld [vmem:[%s2912_s1 + $0x150] sm:$0xff]  ;;  %v60_v26 = vld [vmem:[%s2912_s1 + $0x178] sm:$0xff] }
  0x25   :  { %2175 = vmatprep.mubr.msk.f32.mxu1 %vm2320_vm0, %v2318_v3  ;;  %v1259_v43 = vrot.slane %v1252_v40, %v2403_v17  ;;  %v1067_v52 = vrot.slane %v2460_v46, 3  ;;  %v50_v46 = vld [vmem:[%s2912_s1 + $0x128] sm:$0xff]  ;;  %v208_v57 = vcombine.high %v2437_v31, %v2437_v31  ;;  %v1294_v8 = vcombine.low %v2537_v34, %v2540_v18  ;;  %v45_v34 = vld [vmem:[%s2912_s1 + $0x100] sm:$0xff] }
  0x26   :  { %2159 = vmatmul.mubr.msk.f32.gmra.mxu0 %vm323_vm1, %v2613_v27  ;;  %v1278_v54 = vcombine.low %v2496_v1, %v182_v41  ;;  %v1316_v37 = vrot.slane %v2546_v38, %v2403_v17  ;;  %v1522_v40 = vcombine.low %v2566_v51, %v2601_v19  ;;  %v57_v38 = vld [vmem:[%s2912_s1 + $0x160] sm:$0xff]  ;;  %v2072_v19 = vcombine.high %v2514_v20, %v2583_v59 }
  0x27   :  { %2186 = vmatprep.mubr.msk.f32.mxu0 %vm323_vm1, %v900_v22  ;;  %v1260_v55 = vcombine.low %v1259_v43, %v2463_v47  ;;  %v1068_v56 = vsel %vm1062_vm4, %v1066_v50, %v1067_v52  ;;  %v1488_v4 = vcombine.low %v2448_v36, %v208_v57  ;;  %v1308_v21 = vrot.slane %v1294_v8, %v2403_v17 }
  0x28   :  { %2176 = vmatmul.mubr.msk.f32.gmra.mxu1 %vm323_vm1, %v2617_v29  ;;  %v1292_v47 = vrot.slane %v1278_v54, %v2403_v17  ;;  %v2071_v22 = vcombine.high %v2448_v36, %v2496_v1  ;;  %v54_v36 = vld [vmem:[%s2912_s1 + $0x148] sm:$0xff]  ;;  %vm862_vm5 = vcmask 64512   ;;  %vm864_vm6 = vcmask 57344  }
  0x29   :  { %2197 = vmatprep.mubr.msk.f32.mxu1 %vm323_vm1, %v893_v39  ;;  %v1495_v11 = vrot.slane %v1488_v4, %v2403_v17  ;;  %vm1924_vm7 = vcmask 1041409   ;;  %vm1942_vm8 = vcmask 130048   ;;  %vm1954_vm9 = vcmask 195584  }
  0x2a   :  { %2187 = vmatmul.mubr.msk.f32.vlgmr.msra.gmra.mxu0 %vm323_vm1, %v903_v6  ;;  %v1520_v33 = vrot.slane %v2071_v22, %v2403_v17 }
  0x2b   :  { %2201 = vmatpush3.msra.mxu0 %v44_v53  ;;  %2208 = vmatprep.mubr.msk.f32.mxu0 %vm323_vm1, %v1065_v16  ;;  %v1277_v53 = vcombine.low %v2437_v31, %v2493_v0  ;;  %v1261_v0 = vcombine.low %v2466_v48, %v2469_v49  ;;  %v48_v48 = vld [vmem:[%s2912_s1 + $0x118] sm:$0xff]  ;;  %v47_v31 = vld [vmem:[%s2912_s1 + $0x110] sm:$0xff]  ;;  %v1268_v49 = vrot.slane %v1260_v55, %v2403_v17 }
  0x2c   :  { %2202 = vmatprep.subr.mxu0 %v43_v28  ;;  %2198 = vmatmul.mubr.msk.f32.vlgmr.msra.gmra.mxu1 %vm323_vm1, %v896_v42  ;;  %v1497_v30 = vcombine.low %v2489_v62, %v1495_v11  ;;  %v1521_v39 = vcombine.low %v1520_v33, %v2557_v44  ;;  %v1545_v16 = vrot.slane %v2072_v19, %v2403_v17 }
  0x2d   :  { %2203 = vmatpush3.msra.mxu0 %v43_v28  ;;  %2212 = vmatpush3.msra.mxu1 %v52_v32  ;;  %v1285_v63 = vrot.slane %v1277_v53, %v2403_v17  ;;  %v1275_v2 = vrot.slane %v1261_v0, %v2403_v17 }
  0x2e   :  { %2204 = vmatprep.subr.mxu0 %v42_v45  ;;  %2213 = vmatprep.subr.mxu1 %v2318_v3  ;;  %v1511_v35 = vrot.slane %v1497_v30, %v2403_v17  ;;  %v1529_v51 = vrot.slane %v1521_v39, %v2403_v17  ;;  %v1552_v20 = vrot.slane %v1545_v16, %v2403_v17 }
  0x2f   :  { %2205 = vmatpush3.msra.mxu0 %v42_v45  ;;  %2214 = vmatpush3.msra.mxu1 %v51_v24  ;;  %v1293_v7 = vcombine.low %v1285_v63, %v1292_v47  ;;  %v1276_v18 = vcombine.low %v1268_v49, %v1275_v2 }
  0x30   :  { %2206 = vmatprep.subr.mxu0 %v41_v14  ;;  %2215 = vmatprep.subr.mxu1 %v2318_v3 }
  0x31   :  { %2207 = vmatpush3.msra.mxu0 %v41_v14  ;;  %2216 = vmatpush3.msra.mxu1 %v50_v46  ;;  %v1301_v15 = vrot.slane %v1293_v7, %v2403_v17 }
  0x32   :  { %2209 = vmatmul.mubr.msk.f32.vlgmr.msra.gmra.mxu0 %vm323_vm1, %v1068_v56  ;;  %2217 = vmatprep.subr.mxu1 %v2318_v3 }
  0x33   :  { %2228 = vmatprep.subr.mxu0 %v2318_v3  ;;  %2218 = vmatpush3.msra.mxu1 %v49_v58  ;;  %v1309_v1 = vcombine.low %v1301_v15, %v1308_v21 }
  0x34   :  { %2219 = vmatprep.mubr.msk.f32.mxu1 %vm2320_vm0, %v2318_v3  ;;  %2229 = vmatpush3.msra.mxu0 %v48_v48 }
  0x35   :  { %2220 = vmatmul.mubr.msk.f32.vlgmr.msra.gmra.mxu1 %vm323_vm1, %v2520_v23  ;;  %2230 = vmatprep.subr.mxu0 %v2318_v3  ;;  %v56_v23 = vld [vmem:[%s2912_s1 + $0x158] sm:$0xff] }
  0x36   :  { %2231 = vmatpush3.msra.mxu0 %v47_v31  ;;  %2222 = vmatprep.mubr.msk.f32.mxu1 %vm2320_vm0, %v2318_v3 }
  0x37   :  { %2232 = vmatprep.subr.mxu0 %v2318_v3  ;;  %2245 = vmatprep.subr.mxu1 %v2318_v3 }
  0x38   :  { %2233 = vmatpush3.msra.mxu0 %v46_v10  ;;  %2236 = vmatprep.mubr.msk.f32.mxu0 %vm2320_vm0, %v2318_v3 }
  0x39   :  { %2223 = vmatmul.mubr.msk.f32.gmra.mxu1 %vm323_vm1, %v2597_v13  ;;  %2234 = vmatprep.subr.mxu0 %v2318_v3  ;;  %v1496_v13 = vcombine.low %v2483_v60, %v2486_v61  ;;  %v59_v60 = vld [vmem:[%s2912_s1 + $0x170] sm:$0xff]  ;;  %v53_v61 = vld [vmem:[%s2912_s1 + $0x140] sm:$0xff] }
  0x3a   :  { %2235 = vmatpush3.msra.mxu0 %v45_v34  ;;  %2246 = vmatpush3.msra.mxu1 %v56_v23 }
  0x3b   :  { %2237 = vmatmul.mubr.msk.f32.vlgmr.msra.gmra.mxu0 %vm323_vm1, %v1276_v18  ;;  %2247 = vmatprep.subr.mxu1 %v2318_v3  ;;  %v1504_v62 = vrot.slane %v1496_v13, %v2403_v17 }
  0x3c   :  { %2262 = vmatprep.subr.mxu0 %v2318_v3  ;;  %2225 = vmatprep.mubr.msk.f32.mxu1 %vm2320_vm0, %v2318_v3 }
  0x3d   :  { %2248 = vmatpush3.msra.mxu1 %v55_v25  ;;  %2263 = vmatpush3.msra.mxu0 %v60_v26  ;;  %v1512_v44 = vcombine.low %v1504_v62, %v1511_v35 }
  0x3e   :  { %2226 = vmatmul.mubr.msk.f32.gmra.mxu1 %vm323_vm1, %v2617_v29  ;;  %2249 = vmatprep.subr.mxu1 %v2318_v3  ;;  %v58_v29 = vld [vmem:[%s2912_s1 + $0x168] sm:$0xff] }
  0x3f   :  { %2239 = vmatprep.mubr.msk.f32.mxu0 %vm2320_vm0, %v2318_v3  ;;  %2250 = vmatpush3.msra.mxu1 %v54_v36 }
  0x40   :  { %2264 = vmatprep.subr.mxu0 %v2318_v3  ;;  %2240 = vmatmul.mubr.msk.f32.gmra.mxu0 %vm323_vm1, %v1309_v1 }
  0x41   :  { %2251 = vmatprep.subr.mxu1 %v2318_v3  ;;  %2265 = vmatpush3.msra.mxu0 %v59_v60 }
  0x42   :  { %2252 = vmatpush3.msra.mxu1 %v53_v61  ;;  %2253 = vmatprep.mubr.msk.f32.mxu1 %vm2320_vm0, %v2318_v3 }
  0x43   :  { %2254 = vmatmul.mubr.msk.f32.vlgmr.msra.gmra.mxu1 %vm323_vm1, %v2505_v12  ;;  %2266 = vmatprep.subr.mxu0 %v2318_v3  ;;  %v1536_v12 = vrot.slane %v1522_v40, %v2403_v17 }
  0x44   :  { %2242 = vmatprep.mubr.msk.f32.mxu0 %vm2320_vm0, %v2318_v3  ;;  %2267 = vmatpush3.msra.mxu0 %v58_v29 }
  0x45   :  { %2243 = vmatmul.mubr.msk.f32.gmra.mxu0 %vm323_vm1, %v1316_v37  ;;  %2256 = vmatprep.mubr.msk.f32.mxu1 %vm2320_vm0, %v2318_v3  ;;  %v1537_v6 = vcombine.low %v1529_v51, %v1536_v12 }
  0x46   :  { %2268 = vmatprep.subr.mxu0 %v2318_v3  ;;  %2270 = vmatprep.mubr.msk.f32.mxu0 %vm2320_vm0, %v2318_v3 }
  0x47   :  { %2257 = vmatmul.mubr.msk.f32.gmra.mxu1 %vm323_vm1, %v2588_v5  ;;  %2269 = vmatpush3.msra.mxu0 %v57_v38 }
  0x48   :  { %2259 = vmatprep.mubr.msk.f32.mxu1 %vm2320_vm0, %v2318_v3  ;;  %2279 = vmatprep.subr.mxu1 %v2318_v3 }
  0x49   :  { %2271 = vmatmul.mubr.msk.f32.vlgmr.msra.gmra.mxu0 %vm323_vm1, %v1512_v44 }
  0x4a   :  { %2273 = vmatprep.mubr.msk.f32.mxu0 %vm2320_vm0, %v2318_v3 }
  0x4b   :  { %2260 = vmatmul.mubr.msk.f32.gmra.mxu1 %vm323_vm1, %v2613_v27 }
  0x4c   :  { %2285 = vmatprep.mubr.msk.f32.mxu1 %vm2320_vm0, %v2318_v3 }
  0x4d   :  { %2274 = vmatmul.mubr.msk.f32.gmra.mxu0 %vm323_vm1, %v1537_v6 }
  0x4e   :  { %2276 = vmatprep.mubr.msk.f32.mxu0 %vm2320_vm0, %v2318_v3 }
  0x51   :  { %2277 = vmatmul.mubr.msk.f32.gmra.mxu0 %vm323_vm1, %v1552_v20 }
  0xd8   :  { %v396_v59 = vpop.f32.mrf.mxu0 }
  0xda   :  { %v2154_v5 = vpop.f32.mrf.mxu0  ;;  %v595_v41 = vpop.f32.mrf.mxu1 }
  0xdb   :  { %v596_v42 = vadd.f32 %v595_v41, %v396_v59 }
  0xdc   :  { %v2171_v28 = vpop.f32.mrf.mxu1 }
  0xdd   :  { %v612_v32 = vcombine.high %v596_v42, %v596_v42  ;;  %v619_v27 = vrot.slane %v596_v42, %v2403_v17 }
  0xdf   :  { %v626_v43 = vrot.slane %v612_v32, %v2403_v17  ;;  %v627_v45 = vcombine.high %v619_v27, %v619_v27  ;;  %v635_v52 = vrot.slane %v619_v27, %v2403_v17 }
  0xe1   :  { %v628_v50 = vcombine.high %v626_v43, %v626_v43  ;;  %v649_v24 = vrot.slane %v627_v45, %v2403_v17  ;;  %v642_v53 = vrot.slane %v626_v43, %v2403_v17 }
  0xe2   :  { %v401_v55 = vpop.f32.mrf.mxu0 }
  0xe3   :  { %v656_v54 = vrot.slane %v628_v50, %v2403_v17  ;;  %v732_v14 = vcombine.low %v635_v52, %v649_v24  ;;  %v2054_v46 = vcombine.high %v635_v52, %v649_v24 }
  0xe4   :  { %v2157_v63 = vpop.f32.mrf.mxu0  ;;  %v600_v47 = vpop.f32.mrf.mxu1 }
  0xe5   :  { %v734_v0 = vcombine.low %v642_v53, %v656_v54  ;;  %v2055_v56 = vcombine.high %v642_v53, %v656_v54  ;;  %v742_v57 = vrot.slane %v732_v14, %v2403_v17  ;;  %v749_v58 = vrot.slane %v2054_v46, %v2403_v17 }
  0xe6   :  { %v601_v48 = vadd.f32 %v600_v47, %v401_v55  ;;  %v406_v4 = vpop.f32.mrf.mxu0  ;;  %v2174_v7 = vpop.f32.mrf.mxu1 }
  0xe7   :  { %v756_v31 = vrot.slane %v734_v0, %v2403_v17  ;;  %v763_v49 = vrot.slane %v2055_v56, %v2403_v17  ;;  %v764_v2 = vcombine.low %v742_v57, %v749_v58 }
  0xe8   :  { %v661_v8 = vcombine.high %v601_v48, %v601_v48  ;;  %v668_v10 = vrot.slane %v601_v48, %v2403_v17  ;;  %v2160_v23 = vpop.f32.mrf.mxu0  ;;  %v605_v18 = vpop.f32.mrf.mxu1 }
  0xe9   :  { %v765_v34 = vcombine.low %v756_v31, %v763_v49  ;;  %v606_v22 = vadd.f32 %v605_v18, %v406_v4  ;;  %v772_v25 = vrot.slane %v764_v2, %v2403_v17 }
  0xea   :  { %v675_v11 = vrot.slane %v661_v8, %v2403_v17  ;;  %v676_v15 = vcombine.high %v668_v10, %v668_v10  ;;  %v684_v21 = vrot.slane %v668_v10, %v2403_v17  ;;  %v2177_v13 = vpop.f32.mrf.mxu1  ;;  %v2188_v35 = vpop.f32.mrf.mxu0  ;;  %v884_v10 = vsub.s32 0, %v2373_v9 }
  0xeb   :  { %v779_v26 = vrot.slane %v765_v34, %v2403_v17  ;;  %v716_v62 = vrot.slane %v606_v22, %v2403_v17 }
  0xec   :  { %v677_v30 = vcombine.high %v675_v11, %v675_v11  ;;  %v691_v36 = vrot.slane %v675_v11, %v2403_v17  ;;  %v698_v1 = vrot.slane %v676_v15, %v2403_v17  ;;  %v706_v33 = vcombine.high %v684_v21, %v684_v21  ;;  %v2199_v38 = vpop.f32.mrf.mxu1  ;;  %v974_v42 = vpop.f32.mrf.mxu0 }
  0xed   :  { %v780_v60 = vcombine.low %v772_v25, %v779_v26  ;;  %v787_v61 = vrot.slane %v684_v21, %v2403_v17  ;;  %v717_v12 = vcombine.high %v716_v62, %v716_v62  ;;  %v724_v20 = vrot.slane %v716_v62, %v2403_v17  ;;  %v2841_v25 = vld [vmem:[%s2913_s2] sm:$0x7] }
  0xee   :  { %v705_v29 = vrot.slane %v677_v30, %v2403_v17  ;;  %v707_v37 = vcombine.high %v691_v36, %v691_v36  ;;  %v708_v39 = vcombine.high %v698_v1, %v698_v1  ;;  %v795_v40 = vcombine.low %v698_v1, %v706_v33  ;;  %v1053_v45 = vpop.f32.mrf.mxu1 }
  0xef   :  { %v794_v44 = vrot.slane %v787_v61, %v2403_v17  ;;  %v863_v51 = vsel %vm862_vm5, %v780_v60, -inf  ;;  %v731_v41 = vrot.slane %v717_v12, %v2403_v17  ;;  %v1059_v43 = vadd.f32 %v2199_v38, %v2188_v35 }
  0xf0   :  { %v796_v19 = vcombine.low %v708_v39, %v691_v36  ;;  %v797_v6 = vcombine.low %v705_v29, %v707_v37  ;;  %v709_v16 = vcombine.high %v705_v29, %v705_v29  ;;  %v805_v59 = vrot.slane %v795_v40, %v2403_v17  ;;  %v1946_v39 = vld [vmem:[%s2914_s3 + $0x10] sm:$0xff]  ;;  %v1945_v40 = vld [vmem:[%s2914_s3 + $0x8] sm:$0xff] }
  0xf1   :  { %v865_v5 = vsel %vm864_vm6, %v794_v44, -inf  ;;  %v850_v52 = vrot.slane %v731_v41, %v2403_v17  ;;  %v1054_v0 = vadd.f32 %v1053_v45, %v974_v42  ;;  %v1166_v26 = vsub.s32 1, %v2373_v9  ;;  %2280 = vmatpush3.msra.mxu1 %v1946_v39 }
  0xf2   :  { %v812_v28 = vrot.slane %v796_v19, %v2403_v17  ;;  %v866_v32 = vmax.f32 %v863_v51, %v865_v5  ;;  %v798_v27 = vcombine.low %v709_v16, %v724_v20  ;;  %v819_v50 = vrot.slane %v797_v6, %v2403_v17  ;;  %v2210_v24 = vpop.f32.mrf.mxu0  ;;  %2281 = vmatprep.subr.mxu1 %v2318_v3  ;;  %v1944_v16 = vld [vmem:[%s2914_s3] sm:$0xff]  ;;  %s2321_s3 = smov 8  }
  0xf3   :  { %v1149_v46 = vadd.f32 %v2210_v24, %v1059_v43  ;;  %v857_v55 = vrot.slane %v850_v52, %v2403_v17  ;;  %v885_v60 = vrot.slane %v2841_v25, %v884_v10  ;;  %v1167_v12 = vrot.slane %v2841_v25, %v1166_v26  ;;  %2282 = vmatpush3.msra.mxu1 %v1945_v40 }
  0xf4   :  { %v827_v53 = vcombine.low %v805_v59, %v812_v28  ;;  %v867_v54 = vrot.slane %v866_v32, 4  ;;  %v826_v14 = vrot.slane %v798_v27, %v2403_v17  ;;  %v1139_v56 = vpop.f32.mrf.mxu0  ;;  %2283 = vmatprep.subr.mxu1 %v2318_v3 }
  0xf5   :  { %v1157_v63 = vsel %vm862_vm5, %v1149_v46, -inf  ;;  %v1238_v47 = vpop.f32.mrf.mxu1  ;;  %v874_v48 = vsel %vm864_vm6, %v857_v55, -inf  ;;  %v1148_v49 = vadd.f32 %v1139_v56, %v1054_v0  ;;  %2284 = vmatpush3.msra.mxu1 %v1944_v16 }
  0xf6   :  { %v868_v57 = vmax.f32 %v866_v32, %v867_v54  ;;  %v828_v58 = vcombine.low %v819_v50, %v826_v14  ;;  %v1158_v31 = vrot.slane %v1157_v63, 4  ;;  %v835_v2 = vrot.slane %v827_v53, %v2403_v17 }
  0xf7   :  { %v2221_v7 = vpop.f32.mrf.mxu1  ;;  %v1150_v23 = vsel %vm862_vm5, %v1148_v49, -inf }
  0xf8   :  { %v842_v4 = vrot.slane %v828_v58, %v2403_v17  ;;  %v869_v8 = vrot.slane %v868_v57, 2  ;;  %v1159_v34 = vmax.f32 %v1157_v63, %v1158_v31  ;;  %v1151_v11 = vrot.slane %v1150_v23, 4 }
  0xf9   :  { %v1243_v15 = vpop.f32.mrf.mxu1 }
  0xfa   :  { %v843_v18 = vcombine.low %v835_v2, %v842_v4  ;;  %v870_v21 = vmax.f32 %v868_v57, %v869_v8  ;;  %v1160_v22 = vrot.slane %v1159_v34, 2  ;;  %v1152_v30 = vmax.f32 %v1150_v23, %v1151_v11 }
  0xfb   :  { %v2224_v36 = vpop.f32.mrf.mxu1  ;;  %v1389_v1 = vpop.f32.mrf.mxu0 }
  0xfc   :  { %v873_v13 = vsel %vm862_vm5, %v843_v18, -inf  ;;  %v871_v33 = vrot.slane %v870_v21, 1  ;;  %v1161_v62 = vmax.f32 %v1159_v34, %v1160_v22  ;;  %v1153_v35 = vrot.slane %v1152_v30, 2 }
  0xfd   :  { %v875_v61 = vmax.f32 %v873_v13, %v874_v48  ;;  %v2238_v29 = vpop.f32.mrf.mxu0  ;;  %v1390_v14 = vadd.f32 %v1389_v1, %v1238_v47 }
  0xfe   :  { %v872_v37 = vmax.f32 %v870_v21, %v871_v33  ;;  %v1162_v44 = vrot.slane %v1161_v62, 1  ;;  %v1248_v51 = vpop.f32.mrf.mxu1  ;;  %v1154_v19 = vmax.f32 %v1152_v30, %v1153_v35 }
  0xff   :  { %v876_v38 = vrot.slane %v875_v61, 4 }
 0x100   :  { %v2853_v6 = vadd.f32 %v885_v60, %v872_v37  ;;  %v1163_v20 = vmax.f32 %v1161_v62, %v1162_v44  ;;  %v2227_v59 = vpop.f32.mrf.mxu1  ;;  %v1394_v5 = vpop.f32.mrf.mxu0  ;;  %v1155_v42 = vrot.slane %v1154_v19, 1 }
 0x101   :  { %v877_v41 = vmax.f32 %v875_v61, %v876_v38  ;;  %v1395_v49 = vadd.f32 %v1394_v5, %v1243_v15 }
 0x102   :  { %v2241_v28 = vpop.f32.mrf.mxu0  ;;  %v1169_v32 = vadd.f32 %v1167_v12, %v1163_v20  ;;  %v1156_v45 = vmax.f32 %v1154_v19, %v1155_v42  ;;  %v888_v15 = vmax.f32 %v2853_v6, 0.0 }
 0x103   :  { %v878_v27 = vrot.slane %v877_v41, 2  ;;  %v1469_v43 = vpop.f32.mrf.mxu1 }
 0x104   :  { %v1171_v50 = vmax.f32 %v1169_v32, 0.0  ;;  %v1168_v54 = vadd.f32 %v1167_v12, %v1156_v45  ;;  %v1483_v58 = vadd.f32 %v1469_v43, %v1390_v14 }
 0x105   :  { %v879_v52 = vmax.f32 %v877_v41, %v878_v27  ;;  %v1399_v24 = vpop.f32.mrf.mxu0  ;;  %v2255_v53 = vpop.f32.mrf.mxu1 }
 0x106   :  { %v1929_v46 = vrot.slane %v1171_v50, 7  ;;  %v1170_v57 = vmax.f32 %v1168_v54, 0.0  ;;  %v1400_v13 = vadd.f32 %v1399_v24, %v1248_v51 }
 0x107   :  { %v880_v55 = vrot.slane %v879_v52, 1  ;;  %v2244_v0 = vpop.f32.mrf.mxu0  ;;  %v1474_v56 = vpop.f32.mrf.mxu1 }
 0x108   :  { %v1930_v31 = vsel %vm1924_vm7, %v1929_v46, %v1170_v57  ;;  %v1484_v47 = vadd.f32 %v1474_v56, %v1395_v49 }
 0x109   :  { %v881_v3 = vmax.f32 %v879_v52, %v880_v55  ;;  %v2258_v63 = vpop.f32.mrf.mxu1  ;;  %v1625_v48 = vpop.f32.mrf.mxu0  ;;  %1931 = vrot.lane.b32.xlu0 %v1930_v31, %s2321_s3 }
 0x10a   :  { %v1639_v2 = vadd.f32 %v1625_v48, %v1483_v58 }
 0x10b   :  { %v887_v4 = vadd.f32 %v885_v60, %v881_v3  ;;  %v1479_v7 = vpop.f32.mrf.mxu1  ;;  %v2272_v8 = vpop.f32.mrf.mxu0 }
 0x10c   :  { %v1645_v10 = vcombine.high %v1639_v2, %v1639_v2  ;;  %v1652_v34 = vrot.slane %v1639_v2, %v2403_v17  ;;  %v1485_v35 = vadd.f32 %v1479_v7, %v1400_v13 }
 0x10d   :  { %v889_v23 = vmax.f32 %v887_v4, 0.0  ;;  %v1630_v18 = vpop.f32.mrf.mxu0  ;;  %v2261_v11 = vpop.f32.mrf.mxu1 }
 0x10e   :  { %v1659_v21 = vrot.slane %v1645_v10, %v2403_v17  ;;  %v1660_v22 = vcombine.high %v1652_v34, %v1652_v34  ;;  %v1640_v26 = vadd.f32 %v1630_v18, %v1484_v47  ;;  %v1668_v33 = vrot.slane %v1652_v34, %v2403_v17 }
 0x10f   :  { %v2275_v30 = vpop.f32.mrf.mxu0  ;;  %v1923_v36 = vrot.slane %v889_v23, 7 }
 0x110   :  { %v1661_v1 = vcombine.high %v1659_v21, %v1659_v21  ;;  %v1682_v60 = vrot.slane %v1660_v22, %v2403_v17  ;;  %v1694_v61 = vcombine.high %v1640_v26, %v1640_v26  ;;  %v1675_v62 = vrot.slane %v1659_v21, %v2403_v17 }
 0x111   :  { %v1701_v29 = vrot.slane %v1640_v26, %v2403_v17  ;;  %v1635_v37 = vpop.f32.mrf.mxu0  ;;  %v2869_v39 = vsel %vm1924_vm7, %v1923_v36, %v888_v15 }
 0x112   :  { %v1689_v40 = vrot.slane %v1661_v1, %v2403_v17  ;;  %v1765_v38 = vcombine.low %v1668_v33, %v1682_v60  ;;  %v2076_v44 = vcombine.high %v1668_v33, %v1682_v60  ;;  %v1708_v51 = vrot.slane %v1694_v61, %v2403_v17 }
 0x113   :  { %v1709_v12 = vcombine.high %v1701_v29, %v1701_v29  ;;  %v1717_v19 = vrot.slane %v1701_v29, %v2403_v17  ;;  %v1641_v6 = vadd.f32 %v1635_v37, %v1485_v35  ;;  %v2278_v16 = vpop.f32.mrf.mxu0 }
 0x114   :  { %v1767_v20 = vcombine.low %v1675_v62, %v1689_v40  ;;  %v2077_v59 = vcombine.high %v1675_v62, %v1689_v40  ;;  %v1775_v5 = vrot.slane %v1765_v38, %v2403_v17  ;;  %v1782_v41 = vrot.slane %v2076_v44, %v2403_v17 }
 0x115   :  { %v1710_v42 = vcombine.high %v1708_v51, %v1708_v51  ;;  %v1724_v28 = vrot.slane %v1708_v51, %v2403_v17  ;;  %v1731_v32 = vrot.slane %v1709_v12, %v2403_v17  ;;  %v1739_v27 = vcombine.high %v1717_v19, %v1717_v19 }
 0x116   :  { %v1789_v43 = vrot.slane %v1767_v20, %v2403_v17  ;;  %v1796_v45 = vrot.slane %v2077_v59, %v2403_v17  ;;  %v1797_v50 = vcombine.low %v1775_v5, %v1782_v41  ;;  %v1820_v52 = vrot.slane %v1717_v19, %v2403_v17 }
 0x117   :  { %v1738_v24 = vrot.slane %v1710_v42, %v2403_v17  ;;  %v1740_v53 = vcombine.high %v1724_v28, %v1724_v28  ;;  %v1741_v54 = vcombine.high %v1731_v32, %v1731_v32  ;;  %v1828_v46 = vcombine.low %v1731_v32, %v1739_v27 }
 0x118   :  { %v1798_v14 = vcombine.low %v1789_v43, %v1796_v45  ;;  %v1749_v55 = vrot.slane %v1641_v6, %v2403_v17  ;;  %v1827_v0 = vrot.slane %v1820_v52, %v2403_v17  ;;  %v1805_v3 = vrot.slane %v1797_v50, %v2403_v17 }
 0x119   :  { %v1829_v56 = vcombine.low %v1741_v54, %v1724_v28  ;;  %v1830_v57 = vcombine.low %v1738_v24, %v1740_v53  ;;  %v1742_v58 = vcombine.high %v1738_v24, %v1738_v24  ;;  %v1838_v4 = vrot.slane %v1828_v46, %v2403_v17 }
 0x11a   :  { %v1812_v63 = vrot.slane %v1798_v14, %v2403_v17  ;;  %v1750_v48 = vcombine.high %v1749_v55, %v1749_v55  ;;  %v1757_v31 = vrot.slane %v1749_v55, %v2403_v17  ;;  %v1896_v47 = vsel %vm864_vm6, %v1827_v0, -inf }
 0x11b   :  { %v1845_v49 = vrot.slane %v1829_v56, %v2403_v17  ;;  %v1852_v10 = vrot.slane %v1830_v57, %v2403_v17  ;;  %v1915_v44 = vsub.s32 2, %v2373_v9 }
 0x11c   :  { %v1813_v2 = vcombine.low %v1805_v3, %v1812_v63  ;;  %v1764_v7 = vrot.slane %v1750_v48, %v2403_v17  ;;  %v1831_v8 = vcombine.low %v1742_v58, %v1757_v31 }
 0x11d   :  { %v1860_v34 = vcombine.low %v1838_v4, %v1845_v49 }
 0x11e   :  { %v1895_v23 = vsel %vm862_vm5, %v1813_v2, -inf  ;;  %v1859_v18 = vrot.slane %v1831_v8, %v2403_v17  ;;  %v1883_v11 = vrot.slane %v1764_v7, %v2403_v17 }
 0x11f   :  { %v1897_v21 = vmax.f32 %v1895_v23, %v1896_v47  ;;  %v1868_v13 = vrot.slane %v1860_v34, %v2403_v17 }
 0x120   :  { %v1861_v22 = vcombine.low %v1852_v10, %v1859_v18  ;;  %v1890_v15 = vrot.slane %v1883_v11, %v2403_v17 }
 0x121   :  { %v1898_v26 = vrot.slane %v1897_v21, 4 }
 0x122   :  { %v1875_v30 = vrot.slane %v1861_v22, %v2403_v17  ;;  %v1905_v61 = vsel %vm864_vm6, %v1890_v15, -inf  ;;  %v1916_v17 = vrot.slane %v2841_v25, %v1915_v44  ;;  %v2078_v25 = vld [vmem:[%s2915_s4] ss:$0 sm:$0xff] }
 0x123   :  { %v1899_v36 = vmax.f32 %v1897_v21, %v1898_v26 }
 0x124   :  { %v1876_v1 = vcombine.low %v1868_v13, %v1875_v30 }
 0x125   :  { %v1900_v33 = vrot.slane %v1899_v36, 2 }
 0x126   :  { %v1904_v60 = vsel %vm862_vm5, %v1876_v1, -inf }
 0x127   :  { %v1906_v62 = vmax.f32 %v1904_v60, %v1905_v61  ;;  %v1901_v35 = vmax.f32 %v1899_v36, %v1900_v33 }
 0x129   :  { %v1907_v29 = vrot.slane %v1906_v62, 4  ;;  %v1902_v40 = vrot.slane %v1901_v35, 1 }
 0x12b   :  { %v1908_v37 = vmax.f32 %v1906_v62, %v1907_v29  ;;  %v1903_v12 = vmax.f32 %v1901_v35, %v1902_v40 }
 0x12d   :  { %v1909_v38 = vrot.slane %v1908_v37, 2  ;;  %v1917_v16 = vadd.f32 %v1916_v17, %v1903_v12 }
 0x12f   :  { %v1910_v51 = vmax.f32 %v1908_v37, %v1909_v38  ;;  %v1919_v5 = vmax.f32 %v1917_v16, 0.0 }
 0x131   :  { %v1911_v19 = vrot.slane %v1910_v51, 1 }
 0x133   :  { %v1912_v6 = vmax.f32 %v1910_v51, %v1911_v19 }
 0x135   :  { %v1918_v20 = vadd.f32 %v1916_v17, %v1912_v6 }
 0x137   :  { %v1920_v59 = vmax.f32 %v1918_v20, 0.0 }
 0x139   :  { %v1936_v41 = vrot.slane %v1920_v59, 7 }
 0x13b   :  { %v1937_v42 = vsel %vm1924_vm7, %v1936_v41, %v1919_v5 }
 0x13c   :  { %1938 = vrot.lane.b32.xlu0 %v1937_v42, %s2322_s26 }
 0x17b   :  { %v1932_v28 = vpop.permute.xlu0 %1931 }
 0x17c   :  { %v1941_v9 = vsel %vm862_vm5, %v2869_v39, %v1932_v28 }
 0x1ae   :  { %v1939_v32 = vpop.permute.xlu0 %1938 }
 0x1af   :  { %v1943_v27 = vsel %vm1942_vm8, %v1941_v9, %v1939_v32 }
 0x1b0   :  { %2286 = vmatmul.mubr.msk.f32.vlgmr.msra.gmra.mxu1 %vm1954_vm9, %v1943_v27 }
 0x270   :  { %v2024_v43 = vpop.f32.mrf.mxu1 }
 0x271   :  { %v2025_v45 = vadd.f32 %v2078_v25, %v2024_v43 }
 0x272   :  { %v2287_v50 = vpop.f32.mrf.mxu1 }
 0x273   :  { %2028 = vst [vmem:[#allocation2] sm:$0x3] %v2025_v45 }
 0x274   :  { %2307 = shalt.err (!%p2304_p4)
}
 0x275   :  { %2038 = dma.vmem_to_hbm [thread:$0]  %s2036_s30, 32, %s2916_s5, [#allocation3]  }
 0x276   :  { %2316 = dma.done.wait [#allocation3], 32  }
 0x277   :  { %2317 = vsyncadd [#allocation3], 4294967264 }
 0x278   :  { %2042 = vsyncpa [#allocation3], 1 }

</bundles_post_ra>
